<compile_context>
chip_gen: v7x
topology: tpu7x:2x2x1
jax: 0.10.0
libtpu: 0.0.40
codegen_flags: <defaults>
</compile_context>

<pallas_src>
import functools

import numpy as np
import jax
import jax.numpy as jnp
from jax.experimental import pallas as pl
from jax.experimental.pallas import tpu as pltpu


# ----------------------------------------------------------------------------
# Kernel: 3x3 conv (stride 1, pad 1) + bias (+ relu) on spatially-flattened
# NCHW tensors.  One invocation handles the whole batch of one FPN level with
# a single im2col build and a single MXU matmul.
# ----------------------------------------------------------------------------
def _conv3x3_kernel(x_ref, w_ref, b_ref, m_ref, o_ref, xbuf_ref, *, W, apply_relu):
    # x_ref   : (N, Cin, P)          P = H*W, pixels on lanes
    # w_ref   : (Cout, 9*Cin)        im2col weights (scale already folded in)
    # b_ref   : (Cout, 1)            bias (scale already folded in)
    # m_ref   : (8, N*P)             combined validity mask per non-centre tap
    # o_ref   : (N, Cout, P)         lane-dense output
    # xbuf_ref: (Cin, N*P + 2*HALO)  zero-extended, batch-concatenated input
    N, Cin, P = x_ref.shape
    NP = N * P
    HALO = W + 1  # largest |tap shift| in the flattened layout

    # Zero-extended strip: xbuf[c, HALO + n*P + p] = x[n, c, p], zeros in halos.
    xbuf_ref[...] = jnp.zeros_like(xbuf_ref)
    for n in range(N):                      # N is a small compile-time constant
        xbuf_ref[:, HALO + n * P:HALO + (n + 1) * P] = x_ref[n, :, :]

    # im2col: 9 statically shifted windows of the strip; invalid taps masked.
    pieces = []
    j = 0
    for kh in range(3):                     # dh = kh - 1
        for kw in range(3):                 # dw = kw - 1
            d = (kh - 1) * W + (kw - 1)
            win = xbuf_ref[:, HALO + d:HALO + d + NP]        # (Cin, NP)
            if (kh, kw) != (1, 1):
                win = win * m_ref[j:j + 1, :]                # (1, NP) broadcast
                j += 1
            pieces.append(win)
    xcol = jnp.concatenate(pieces, axis=0)                   # (9*Cin, NP)

    # One MXU matmul for the entire batch of this level.
    acc = jnp.dot(w_ref[...], xcol,
                  preferred_element_type=jnp.float32)        # (Cout, NP)
    acc = acc + b_ref[...]
    if apply_relu:
        acc = jnp.maximum(acc, 0.0)

    for n in range(N):
        o_ref[n, :, :] = acc[:, n * P:(n + 1) * P].astype(o_ref.dtype)


def conv3x3_bias_scale_relu(x_nchw, w_oihw, bias, scale, *, apply_relu):
    """x_nchw: (N,Cin,H,W); w_oihw: (Cout,Cin,3,3) (PyTorch layout);
    bias: (Cout,); scale: (1,)-array or None (folded into weights/bias)."""
    N, Cin, H, W = x_nchw.shape
    Cout = w_oihw.shape[0]
    P = H * W
    NP = N * P
    HALO = W + 1

    # im2col weight matrix: column t*Cin + ci holds w[:, ci, kh, kw], t = kh*3+kw.
    w_mat = jnp.transpose(w_oihw, (0, 2, 3, 1)).reshape(Cout, 9 * Cin)
    b_col = bias.reshape(Cout, 1).astype(jnp.float32)
    if scale is not None:
        s = jnp.asarray(scale).reshape(())
        w_mat = w_mat * s           # fold per-level scale: (conv+b)*s == conv_{sW}+sb
        b_col = b_col * s

    # Per-tap validity masks over the batch-concatenated flat pixel index
    # (trace-time numpy constants).  One combined mask per non-centre tap.
    q = np.arange(NP)
    p = q % P
    hh = p // W
    ww = p % W
    m_top, m_bot = hh >= 1, hh <= H - 2
    m_lft, m_rgt = ww >= 1, ww <= W - 2
    rows = []
    for kh in range(3):
        for kw in range(3):
            if (kh, kw) == (1, 1):
                continue
            m = np.ones(NP, dtype=bool)
            if kh == 0:
                m &= m_top
            elif kh == 2:
                m &= m_bot
            if kw == 0:
                m &= m_lft
            elif kw == 2:
                m &= m_rgt
            rows.append(m)
    masks = jnp.asarray(np.stack(rows).astype(np.float32)).astype(x_nchw.dtype)

    x_flat = x_nchw.reshape(N, Cin, P)      # contiguous reshape -> no HBM copy

    kernel = functools.partial(_conv3x3_kernel, W=W, apply_relu=apply_relu)
    out_flat = pl.pallas_call(
        kernel,
        out_shape=jax.ShapeDtypeStruct((N, Cout, P), x_nchw.dtype),
        grid=(1,),                           # whole level fits one VMEM block
        in_specs=[
            pl.BlockSpec((N, Cin, P), lambda i: (0, 0, 0)),
            pl.BlockSpec((Cout, 9 * Cin), lambda i: (0, 0)),
            pl.BlockSpec((Cout, 1), lambda i: (0, 0)),
            pl.BlockSpec((8, NP), lambda i: (0, 0)),
        ],
        out_specs=pl.BlockSpec((N, Cout, P), lambda i: (0, 0, 0)),
        scratch_shapes=[pltpu.VMEM((Cin, NP + 2 * HALO), x_nchw.dtype)],
        compiler_params=pltpu.CompilerParams(
            dimension_semantics=("arbitrary",)),
    )(x_flat, w_mat.astype(x_nchw.dtype), b_col, masks)

    return out_flat.reshape(N, Cout, H, W)  # contiguous reshape -> no HBM copy


# ----------------------------------------------------------------------------
# Module-level wrapper mirroring Output.forward (dict in -> dict out, NCHW).
# ----------------------------------------------------------------------------
def output_forward(x_dict, params, *, apply_scale, apply_relu):
    w_oihw = params["weight"]       # (Cout, Cin, 3, 3)
    bias = params["bias"]           # (Cout,)
    scales = params.get("scales")   # list of (1,) arrays or None

    keys = list(x_dict.keys())
    out = {}
    for i, k in enumerate(keys):
        scale = None
        if apply_scale and scales is not None and i < len(scales):
            scale = scales[i]       # Output only scales the first n_scale keys
        out[k] = conv3x3_bias_scale_relu(
            x_dict[k], w_oihw, bias, scale, apply_relu=apply_relu)
    return out


# ----------------------------------------------------------------------------
# Pure-JAX reference (lax.conv) for correctness check.
# ----------------------------------------------------------------------------
def output_forward_ref(x_dict, params, *, apply_scale, apply_relu):
    w_oihw = params["weight"]
    bias = params["bias"]
    scales = params.get("scales")
    keys = list(x_dict.keys())
    out = {}
    for i, k in enumerate(keys):
        y = jax.lax.conv_general_dilated(
            x_dict[k], w_oihw, window_strides=(1, 1), padding=((1, 1), (1, 1)),
            dimension_numbers=("NCHW", "OIHW", "NCHW"))
        y = y + bias.reshape(1, -1, 1, 1)
        if apply_scale and scales is not None and i < len(scales):
            y = y * scales[i][0]
        if apply_relu:
            y = jnp.maximum(y, 0.0)
        out[k] = y
    return out


if __name__ == "__main__":
    key = jax.random.PRNGKey(0)
    k_w, k_b, k_x3, k_x4 = jax.random.split(key, 4)

    in_channels, out_channels = 4, 8
    batch = 2
    apply_scale, apply_relu = True, True

    # Deterministic synthetic parameters (Conv2d(in=4, out=8, k=3, pad=1)).
    params = {
        "weight": jax.random.normal(
            k_w, (out_channels, in_channels, 3, 3), jnp.float32) * 0.1,
        "bias": jax.random.normal(k_b, (out_channels,), jnp.float32) * 0.1,
        "scales": [
            jnp.array([1.0], jnp.float32),
            jnp.array([1.5], jnp.float32),
        ],
    }

    # Dict of feature maps (NCHW), two FPN-like levels.
    x_dict = {
        "p3": jax.random.normal(k_x3, (batch, in_channels, 16, 16), jnp.float32),
        "p4": jax.random.normal(k_x4, (batch, in_channels, 8, 8), jnp.float32),
    }

    out = output_forward(
        x_dict, params, apply_scale=apply_scale, apply_relu=apply_relu)
    out = jax.tree_util.tree_map(jax.block_until_ready, out)

    ref = output_forward_ref(
        x_dict, params, apply_scale=apply_scale, apply_relu=apply_relu)
    for k in x_dict:
        assert out[k].shape == ref[k].shape, (k, out[k].shape, ref[k].shape)
        assert jnp.allclose(out[k], ref[k], atol=1e-4, rtol=1e-4), k

    print("KERNEL_OK")
</pallas_src>

<mosaic_0001>
module attributes {stable_mosaic.version = 11 : i64} {
  func.func @_conv3x3_kernel(%arg0: i32, %arg1: memref<2x4x256xf32, #tpu.memory_space<vmem>>, %arg2: memref<8x36xf32, #tpu.memory_space<vmem>>, %arg3: memref<8x1xf32, #tpu.memory_space<vmem>>, %arg4: memref<8x512xf32, #tpu.memory_space<vmem>>, %arg5: memref<2x8x256xf32, #tpu.memory_space<vmem>>, %arg6: memref<4x546xf32, #tpu.memory_space<vmem>>) attributes {dimension_semantics = [#tpu.dimension_semantics<arbitrary>], iteration_bounds = array<i64: 1>, scalar_prefetch = 0 : i64, scratch_operands = 1 : i64, tpu.core_type = #tpu.core_type<tc>, window_params = [{pipeline_mode = #tpu.pipeline_mode<synchronous>, transform_indices = @transform_0, window_bounds = array<i64: 2, 4, 256>}, {pipeline_mode = #tpu.pipeline_mode<synchronous>, transform_indices = @transform_1, window_bounds = array<i64: 8, 36>}, {pipeline_mode = #tpu.pipeline_mode<synchronous>, transform_indices = @transform_2, window_bounds = array<i64: 8, 1>}, {pipeline_mode = #tpu.pipeline_mode<synchronous>, transform_indices = @transform_3, window_bounds = array<i64: 8, 512>}, {pipeline_mode = #tpu.pipeline_mode<synchronous>, transform_indices = @transform_4, window_bounds = array<i64: 2, 8, 256>}]} {
    %cst = arith.constant 0.000000e+00 : f32
    %0 = vector.broadcast %cst : f32 to vector<4x546xf32>
    %c0 = arith.constant 0 : index
    %c0_0 = arith.constant 0 : index
    %1 = vector.load %arg6[%c0, %c0_0] : memref<4x546xf32, #tpu.memory_space<vmem>>, vector<4x546xf32>
    tpu.vector_store %arg6[%c0, %c0_0], %0 {strides = array<i32>} : memref<4x546xf32, #tpu.memory_space<vmem>>, vector<4x546xf32>,
    %c0_1 = arith.constant 0 : index
    %c0_2 = arith.constant 0 : index
    %c0_3 = arith.constant 0 : index
    %2 = vector.load %arg1[%c0_1, %c0_2, %c0_3] : memref<2x4x256xf32, #tpu.memory_space<vmem>>, vector<1x4x256xf32>
    %3 = vector.shape_cast %2 : vector<1x4x256xf32> to vector<4x256xf32>
    %c0_4 = arith.constant 0 : index
    %c17 = arith.constant 17 : index
    %4 = vector.load %arg6[%c0_4, %c17] : memref<4x546xf32, #tpu.memory_space<vmem>>, vector<4x256xf32>
    tpu.vector_store %arg6[%c0_4, %c17], %3 {strides = array<i32>} : memref<4x546xf32, #tpu.memory_space<vmem>>, vector<4x256xf32>,
    %c1 = arith.constant 1 : index
    %c0_5 = arith.constant 0 : index
    %c0_6 = arith.constant 0 : index
    %5 = vector.load %arg1[%c1, %c0_5, %c0_6] : memref<2x4x256xf32, #tpu.memory_space<vmem>>, vector<1x4x256xf32>
    %6 = vector.shape_cast %5 : vector<1x4x256xf32> to vector<4x256xf32>
    %c0_7 = arith.constant 0 : index
    %c273 = arith.constant 273 : index
    %7 = vector.load %arg6[%c0_7, %c273] : memref<4x546xf32, #tpu.memory_space<vmem>>, vector<4x256xf32>
    tpu.vector_store %arg6[%c0_7, %c273], %6 {strides = array<i32>} : memref<4x546xf32, #tpu.memory_space<vmem>>, vector<4x256xf32>,
    %c0_8 = arith.constant 0 : index
    %c0_9 = arith.constant 0 : index
    %8 = vector.load %arg6[%c0_8, %c0_9] : memref<4x546xf32, #tpu.memory_space<vmem>>, vector<4x512xf32>
    %c0_10 = arith.constant 0 : index
    %c0_11 = arith.constant 0 : index
    %9 = vector.load %arg4[%c0_10, %c0_11] : memref<8x512xf32, #tpu.memory_space<vmem>>, vector<1x512xf32>
    %10 = vector.broadcast %9 : vector<1x512xf32> to vector<4x512xf32>
    %11 = arith.mulf %8, %10 : vector<4x512xf32>
    %c0_12 = arith.constant 0 : index
    %c1_13 = arith.constant 1 : index
    %12 = vector.load %arg6[%c0_12, %c1_13] : memref<4x546xf32, #tpu.memory_space<vmem>>, vector<4x512xf32>
    %c1_14 = arith.constant 1 : index
    %c0_15 = arith.constant 0 : index
    %13 = vector.load %arg4[%c1_14, %c0_15] : memref<8x512xf32, #tpu.memory_space<vmem>>, vector<1x512xf32>
    %14 = vector.broadcast %13 : vector<1x512xf32> to vector<4x512xf32>
    %15 = arith.mulf %12, %14 : vector<4x512xf32>
    %c0_16 = arith.constant 0 : index
    %c2 = arith.constant 2 : index
    %16 = vector.load %arg6[%c0_16, %c2] : memref<4x546xf32, #tpu.memory_space<vmem>>, vector<4x512xf32>
    %c2_17 = arith.constant 2 : index
    %c0_18 = arith.constant 0 : index
    %17 = vector.load %arg4[%c2_17, %c0_18] : memref<8x512xf32, #tpu.memory_space<vmem>>, vector<1x512xf32>
    %18 = vector.broadcast %17 : vector<1x512xf32> to vector<4x512xf32>
    %19 = arith.mulf %16, %18 : vector<4x512xf32>
    %c0_19 = arith.constant 0 : index
    %c16 = arith.constant 16 : index
    %20 = vector.load %arg6[%c0_19, %c16] : memref<4x546xf32, #tpu.memory_space<vmem>>, vector<4x512xf32>
    %c3 = arith.constant 3 : index
    %c0_20 = arith.constant 0 : index
    %21 = vector.load %arg4[%c3, %c0_20] : memref<8x512xf32, #tpu.memory_space<vmem>>, vector<1x512xf32>
    %22 = vector.broadcast %21 : vector<1x512xf32> to vector<4x512xf32>
    %23 = arith.mulf %20, %22 : vector<4x512xf32>
    %c0_21 = arith.constant 0 : index
    %c17_22 = arith.constant 17 : index
    %24 = vector.load %arg6[%c0_21, %c17_22] : memref<4x546xf32, #tpu.memory_space<vmem>>, vector<4x512xf32>
    %c0_23 = arith.constant 0 : index
    %c18 = arith.constant 18 : index
    %25 = vector.load %arg6[%c0_23, %c18] : memref<4x546xf32, #tpu.memory_space<vmem>>, vector<4x512xf32>
    %c4 = arith.constant 4 : index
    %c0_24 = arith.constant 0 : index
    %26 = vector.load %arg4[%c4, %c0_24] : memref<8x512xf32, #tpu.memory_space<vmem>>, vector<1x512xf32>
    %27 = vector.broadcast %26 : vector<1x512xf32> to vector<4x512xf32>
    %28 = arith.mulf %25, %27 : vector<4x512xf32>
    %c0_25 = arith.constant 0 : index
    %c32 = arith.constant 32 : index
    %29 = vector.load %arg6[%c0_25, %c32] : memref<4x546xf32, #tpu.memory_space<vmem>>, vector<4x512xf32>
    %c5 = arith.constant 5 : index
    %c0_26 = arith.constant 0 : index
    %30 = vector.load %arg4[%c5, %c0_26] : memref<8x512xf32, #tpu.memory_space<vmem>>, vector<1x512xf32>
    %31 = vector.broadcast %30 : vector<1x512xf32> to vector<4x512xf32>
    %32 = arith.mulf %29, %31 : vector<4x512xf32>
    %c0_27 = arith.constant 0 : index
    %c33 = arith.constant 33 : index
    %33 = vector.load %arg6[%c0_27, %c33] : memref<4x546xf32, #tpu.memory_space<vmem>>, vector<4x512xf32>
    %c6 = arith.constant 6 : index
    %c0_28 = arith.constant 0 : index
    %34 = vector.load %arg4[%c6, %c0_28] : memref<8x512xf32, #tpu.memory_space<vmem>>, vector<1x512xf32>
    %35 = vector.broadcast %34 : vector<1x512xf32> to vector<4x512xf32>
    %36 = arith.mulf %33, %35 : vector<4x512xf32>
    %c0_29 = arith.constant 0 : index
    %c34 = arith.constant 34 : index
    %37 = vector.load %arg6[%c0_29, %c34] : memref<4x546xf32, #tpu.memory_space<vmem>>, vector<4x512xf32>
    %c7 = arith.constant 7 : index
    %c0_30 = arith.constant 0 : index
    %38 = vector.load %arg4[%c7, %c0_30] : memref<8x512xf32, #tpu.memory_space<vmem>>, vector<1x512xf32>
    %39 = vector.broadcast %38 : vector<1x512xf32> to vector<4x512xf32>
    %40 = arith.mulf %37, %39 : vector<4x512xf32>
    %41 = tpu.concatenate %11, %15, %19, %23, %24, %28, %32, %36, %40 in 0 : vector<4x512xf32>, vector<4x512xf32>, vector<4x512xf32>, vector<4x512xf32>, vector<4x512xf32>, vector<4x512xf32>, vector<4x512xf32>, vector<4x512xf32>, vector<4x512xf32> -> vector<36x512xf32>
    %c0_31 = arith.constant 0 : index
    %c0_32 = arith.constant 0 : index
    %42 = vector.load %arg2[%c0_31, %c0_32] : memref<8x36xf32, #tpu.memory_space<vmem>>, vector<8x36xf32>
    %cst_33 = arith.constant dense<0.000000e+00> : vector<8x512xf32>
    %43 = tpu.matmul %42, %41, %cst_33 {dimension_numbers = #tpu.dot_dimension_numbers<[1], [0], [0], [1], [0, 0, 1, 1], [], []>} : vector<8x36xf32>, vector<36x512xf32>, vector<8x512xf32> -> vector<8x512xf32>
    %c0_34 = arith.constant 0 : index
    %c0_35 = arith.constant 0 : index
    %44 = vector.load %arg3[%c0_34, %c0_35] : memref<8x1xf32, #tpu.memory_space<vmem>>, vector<8x1xf32>
    %45 = vector.broadcast %44 : vector<8x1xf32> to vector<8x512xf32>
    %46 = arith.addf %43, %45 : vector<8x512xf32>
    %cst_36 = arith.constant 0.000000e+00 : f32
    %47 = vector.broadcast %cst_36 : f32 to vector<8x512xf32>
    %48 = arith.maximumf %46, %47 : vector<8x512xf32>
    %49 = vector.extract_strided_slice %48 {offsets = [0, 0], sizes = [8, 256], strides = [1, 1]} : vector<8x512xf32> to vector<8x256xf32>
    %c0_37 = arith.constant 0 : index
    %c0_38 = arith.constant 0 : index
    %c0_39 = arith.constant 0 : index
    %50 = vector.load %arg5[%c0_37, %c0_38, %c0_39] : memref<2x8x256xf32, #tpu.memory_space<vmem>>, vector<1x8x256xf32>
    %51 = vector.shape_cast %50 : vector<1x8x256xf32> to vector<8x256xf32>
    %52 = vector.shape_cast %49 : vector<8x256xf32> to vector<1x8x256xf32>
    tpu.vector_store %arg5[%c0_37, %c0_38, %c0_39], %52 {strides = array<i32>} : memref<2x8x256xf32, #tpu.memory_space<vmem>>, vector<1x8x256xf32>,
    %53 = vector.extract_strided_slice %48 {offsets = [0, 256], sizes = [8, 256], strides = [1, 1]} : vector<8x512xf32> to vector<8x256xf32>
    %c1_40 = arith.constant 1 : index
    %c0_41 = arith.constant 0 : index
    %c0_42 = arith.constant 0 : index
    %54 = vector.load %arg5[%c1_40, %c0_41, %c0_42] : memref<2x8x256xf32, #tpu.memory_space<vmem>>, vector<1x8x256xf32>
    %55 = vector.shape_cast %54 : vector<1x8x256xf32> to vector<8x256xf32>
    %56 = vector.shape_cast %53 : vector<8x256xf32> to vector<1x8x256xf32>
    tpu.vector_store %arg5[%c1_40, %c0_41, %c0_42], %56 {strides = array<i32>} : memref<2x8x256xf32, #tpu.memory_space<vmem>>, vector<1x8x256xf32>,
    return
  }
  func.func @transform_0(%arg0: i32) -> (i32, i32, i32) {
    %c0_i32 = arith.constant 0 : i32
    %c0_i32_0 = arith.constant 0 : i32
    %c0_i32_1 = arith.constant 0 : i32
    %c0_i32_2 = arith.constant 0 : i32
    return %c0_i32, %c0_i32_0, %c0_i32_1 : i32, i32, i32
  }
  func.func @transform_1(%arg0: i32) -> (i32, i32) {
    %c0_i32 = arith.constant 0 : i32
    %c0_i32_0 = arith.constant 0 : i32
    %c0_i32_1 = arith.constant 0 : i32
    return %c0_i32, %c0_i32_0 : i32, i32
  }
  func.func @transform_2(%arg0: i32) -> (i32, i32) {
    %c0_i32 = arith.constant 0 : i32
    %c0_i32_0 = arith.constant 0 : i32
    %c0_i32_1 = arith.constant 0 : i32
    return %c0_i32, %c0_i32_0 : i32, i32
  }
  func.func @transform_3(%arg0: i32) -> (i32, i32) {
    %c0_i32 = arith.constant 0 : i32
    %c0_i32_0 = arith.constant 0 : i32
    %c0_i32_1 = arith.constant 0 : i32
    return %c0_i32, %c0_i32_0 : i32, i32
  }
  func.func @transform_4(%arg0: i32) -> (i32, i32, i32) {
    %c0_i32 = arith.constant 0 : i32
    %c0_i32_0 = arith.constant 0 : i32
    %c0_i32_1 = arith.constant 0 : i32
    %c0_i32_2 = arith.constant 0 : i32
    return %c0_i32, %c0_i32_0, %c0_i32_1 : i32, i32, i32
  }
}

</mosaic_0001>

<bundles_post_ra>
// kernel: tpu_custom_call.1
= control target key start
LH: loop header
LB: loop body
LE: loop exit
PB: predicated region body
PF: predicated region fallthrough
CT: control target
= control target key end

     0   :  { %9 = vsyncpa [#allocation4], 0  ;;  %s1314_s0 = inlined_call_operand.hbm [shape: f32[2,4,256], index: 0, kind: input, shape index: {}]   ;;  %s1315_s1 = inlined_call_operand.vmem [shape: f32[8,36], index: 1, kind: input, shape index: {}]   ;;  %s1316_s2 = inlined_call_operand.vmem [shape: f32[8,1], index: 2, kind: input, shape index: {}]   ;;  %s1317_s3 = inlined_call_operand.hbm [shape: f32[8,512], index: 3, kind: input, shape index: {}]   ;;  %s1318_s4 = inlined_call_operand.hbm [shape: f32[2,8,256], index: 4, kind: output, shape index: {}]  }
   0x1   :  { %10 = vsyncpa [#allocation7], 0 }
   0x2   :  { %11 = vsyncpa [#allocation5], 0  ;;  %s953_s15 = smov [#allocation3]   ;;  %s881_s19 = scalar_lea.hbm %s1314_s0, 256 }
   0x3   :  { %s17_s16 = sshll.u32 %s953_s15, 4  ;;  %p882_p0 = scmp.ne.s32.totalorder %s1314_s0, %s881_s19  ;;  %s18_s16 = int_to_ptr.vmem [resolvable:$true] %s17_s16 }
   0x4   :  { %p885_p1 = scmp.lt.u32.totalorder %s881_s19, %s1314_s0 }
   0x6   :  { %p887_p2 = pnand %p885_p1, %p882_p0 }
   0x8   :  { %890 = shalt.err (!%p887_p2)
}
   0x9   :  { %s891_s24 = scalar_lea.vmem %s18_s16, 256  ;;  %p896_p4 = scmp.lt.s32.totalorder %s18_s16, %s18_s16 }
   0xa   :  { %p892_p3 = scmp.ne.s32.totalorder %s18_s16, %s891_s24  ;;  %p897_p5 = scmp.lt.s32.totalorder %s891_s24, %s891_s24 }
   0xc   :  { %p898_p6 = por %p897_p5, %p896_p4 }
   0xe   :  { %p899_p7 = pnand %p898_p6, %p892_p3 }
  0x10   :  { %902 = shalt.err (!%p899_p7)
}
  0x11   :  { %s954_s25 = smov 128   ;;  %s955_s26 = smov 8  }
  0x12   :  { %23 = dma.hbm_to_vmem [thread:$0]  %s1314_s0, 256, %s18_s16, [#allocation4], %s954_s25, %s954_s25, %s955_s26  }
  0x13   :  { %s956_s29 = smov [#allocation6]   ;;  %s903_s7 = scalar_lea.hbm %s1317_s3, 512 }
  0x14   :  { %s34_s30 = sshll.u32 %s956_s29, 4  ;;  %p904_p8 = scmp.ne.s32.totalorder %s1317_s3, %s903_s7  ;;  %s35_s30 = int_to_ptr.vmem [resolvable:$true] %s34_s30 }
  0x15   :  { %p907_p9 = scmp.lt.u32.totalorder %s903_s7, %s1317_s3 }
  0x17   :  { %p909_p10 = pnand %p907_p9, %p904_p8 }
  0x19   :  { %912 = shalt.err (!%p909_p10)
}
  0x1a   :  { %s913_s12 = scalar_lea.vmem %s35_s30, 512  ;;  %p918_p12 = scmp.lt.s32.totalorder %s35_s30, %s35_s30 }
  0x1b   :  { %p914_p11 = scmp.ne.s32.totalorder %s35_s30, %s913_s12  ;;  %p919_p13 = scmp.lt.s32.totalorder %s913_s12, %s913_s12 }
  0x1d   :  { %p920_p0 = por %p919_p13, %p918_p12 }
  0x1f   :  { %p921_p1 = pnand %p920_p0, %p914_p11 }
  0x21   :  { %924 = shalt.err (!%p921_p1)
}
  0x22   :  { %37 = dma.hbm_to_vmem [thread:$0]  %s1317_s3, 512, %s35_s30, [#allocation7]  }
  0x23   :  { %947 = dma.done.wait [#allocation4], 256  }
  0x24   :  { %948 = vsyncadd [#allocation4], 4294967040 }
  0x25   :  { %949 = dma.done.wait [#allocation7], 512  }
  0x26   :  { %950 = vsyncadd [#allocation7], 4294966784  ;;  %v78_v0 = vlaneseq  ;;  %v957_v1 = vmov 0.0   ;;  %vm46_vm0 = vcmask 273408   ;;  %v48_v7 = vld [vmem:[#allocation3] sm:$0xff]  ;;  %s958_s3 = smov 17  }
  0x27   :  { %44 = vst [vmem:[#allocation2] sm:$0xff] %v957_v1  ;;  %45 = vst [vmem:[#allocation2 + $0x8] sm:$0xff] %v957_v1  ;;  %658 = vmatprep.mubr.f32.mxu0 %v957_v1  ;;  %729 = vmatprep.mubr.f32.mxu1 %v957_v1  ;;  %v102_v8 = vld [vmem:[#allocation6 + $0x1] ss:$8 sm:$0xf]  ;;  %s959_s14 = smov 1  }
  0x28   :  { %v79_v2 = vshrl.u32 %v78_v0, 7  ;;  %47 = vst.msk [vmem:[#allocation2 + $0x10] sm:$0xf] %vm46_vm0, %v957_v1  ;;  %50 = vrot.lane.b32.xlu0 %v48_v7, %s958_s3  ;;  %v140_v13 = vld [vmem:[#allocation6 + $0x2] ss:$8 sm:$0xf] }
  0x29   :  { %v64_v14 = vld [vmem:[#allocation3 + $0x8] sm:$0xff]  ;;  %s960_s15 = smov 2   ;;  %s961_s16 = smov 16   ;;  %vm57_vm1 = vcmask 1043592   ;;  %vm58_vm2 = vcmask 1047556   ;;  %vm53_vm3 = vcmask 138240  }
  0x2a   :  { %v1026_v3 = vsub.s32 0, %v79_v2  ;;  %v1028_v4 = vsub.s32 1, %v79_v2  ;;  %v1030_v5 = vsub.s32 2, %v79_v2  ;;  %v1032_v6 = vsub.s32 3, %v79_v2  ;;  %s962_s17 = smov 18   ;;  %s963_s18 = smov 32   ;;  %vm59_vm5 = vmor %vm58_vm2, %vm57_vm1 }
  0x2b   :  { %v177_v17 = vld [vmem:[#allocation6 + $0x3] ss:$8 sm:$0xf]  ;;  %v214_v25 = vld [vmem:[#allocation6 + $0x4] ss:$8 sm:$0xf] }
  0x2c   :  { %v107_v9 = vrot.slane %v102_v8, %v1026_v3  ;;  %v111_v10 = vrot.slane %v102_v8, %v1028_v4  ;;  %v115_v11 = vrot.slane %v102_v8, %v1030_v5  ;;  %v119_v12 = vrot.slane %v102_v8, %v1032_v6  ;;  %66 = vrot.lane.b32.xlu0 %v64_v14, %s958_s3  ;;  %v76_v32 = vld [vmem:[#allocation6] ss:$8 sm:$0xf]  ;;  %v251_v33 = vld [vmem:[#allocation6 + $0x5] ss:$8 sm:$0xf] }
  0x2d   :  { %v145_v15 = vrot.slane %v140_v13, %v1026_v3  ;;  %v149_v16 = vrot.slane %v140_v13, %v1028_v4  ;;  %v153_v20 = vrot.slane %v140_v13, %v1030_v5  ;;  %v157_v21 = vrot.slane %v140_v13, %v1032_v6  ;;  %v288_v44 = vld [vmem:[#allocation6 + $0x6] ss:$8 sm:$0xf]  ;;  %v325_v53 = vld [vmem:[#allocation6 + $0x7] ss:$8 sm:$0xf] }
  0x2e   :  { %v120_v18 = vcombine.low %v107_v9, %v111_v10  ;;  %v121_v19 = vcombine.low %v115_v11, %v119_v12  ;;  %v182_v23 = vrot.slane %v177_v17, %v1026_v3  ;;  %v186_v24 = vrot.slane %v177_v17, %v1028_v4  ;;  %s964_s19 = smov 33   ;;  %s965_s20 = smov 34  }
  0x2f   :  { %v158_v22 = vcombine.low %v145_v15, %v149_v16  ;;  %v190_v26 = vrot.slane %v177_v17, %v1030_v5  ;;  %v194_v27 = vrot.slane %v177_v17, %v1032_v6  ;;  %v159_v28 = vcombine.low %v153_v20, %v157_v21  ;;  %s966_s21 = smov 111   ;;  %s967_s22 = smov 126  }
  0x30   :  { %122 = vrot.lane.b32.xlu1 %v120_v18, %s959_s14  ;;  %v195_v29 = vcombine.low %v182_v23, %v186_v24  ;;  %v219_v30 = vrot.slane %v214_v25, %v1026_v3  ;;  %v223_v31 = vrot.slane %v214_v25, %v1028_v4  ;;  %v227_v35 = vrot.slane %v214_v25, %v1030_v5  ;;  %s968_s23 = smov 96   ;;  %s969_s24 = smov 110  }
  0x31   :  { %160 = vrot.lane.b32.xlu0 %v158_v22, %s960_s15  ;;  %v196_v34 = vcombine.low %v190_v26, %v194_v27  ;;  %v89_v36 = vrot.slane %v76_v32, %v1030_v5  ;;  %v231_v37 = vrot.slane %v214_v25, %v1032_v6  ;;  %v93_v38 = vrot.slane %v76_v32, %v1032_v6  ;;  %s970_s25 = smov 127   ;;  %s971_s26 = smov 112  }
  0x32   :  { %v81_v39 = vrot.slane %v76_v32, %v1026_v3  ;;  %v85_v40 = vrot.slane %v76_v32, %v1028_v4  ;;  %v232_v41 = vcombine.low %v219_v30, %v223_v31  ;;  %v256_v42 = vrot.slane %v251_v33, %v1026_v3  ;;  %s972_s27 = smov 95   ;;  %s973_s28 = smov 94  }
  0x33   :  { %v260_v43 = vrot.slane %v251_v33, %v1028_v4  ;;  %v1057_v45 = vcombine.low %v89_v36, %v93_v38  ;;  %v233_v47 = vcombine.low %v227_v35, %v231_v37  ;;  %v264_v48 = vrot.slane %v251_v33, %v1030_v5 }
  0x34   :  { %124 = vrot.lane.b32.xlu1 %v121_v19, %s959_s14  ;;  %v94_v46 = vcombine.low %v81_v39, %v85_v40  ;;  %v268_v49 = vrot.slane %v251_v33, %v1032_v6  ;;  %v293_v51 = vrot.slane %v288_v44, %v1026_v3  ;;  %v297_v52 = vrot.slane %v288_v44, %v1028_v4 }
  0x35   :  { %197 = vrot.lane.b32.xlu0 %v195_v29, %s961_s16  ;;  %v269_v50 = vcombine.low %v256_v42, %v260_v43  ;;  %v301_v55 = vrot.slane %v288_v44, %v1030_v5  ;;  %v305_v56 = vrot.slane %v288_v44, %v1032_v6  ;;  %v330_v58 = vrot.slane %v325_v53, %v1026_v3 }
  0x36   :  { %v270_v54 = vcombine.low %v264_v48, %v268_v49  ;;  %v306_v57 = vcombine.low %v293_v51, %v297_v52  ;;  %v334_v59 = vrot.slane %v325_v53, %v1028_v4  ;;  %v338_v60 = vrot.slane %v325_v53, %v1030_v5 }
  0x37   :  { %v307_v61 = vcombine.low %v301_v55, %v305_v56  ;;  %v342_v63 = vrot.slane %v325_v53, %v1032_v6  ;;  %vm61_vm4 = vcmask 134144   ;;  %vm166_vm6 = vcmask 15360  }
  0x38   :  { %162 = vrot.lane.b32.xlu1 %v159_v28, %s960_s15  ;;  %v343_v62 = vcombine.low %v330_v58, %v334_v59  ;;  %vm130_vm7 = vcmask 1043456   ;;  %vm128_vm8 = vcmask 7168   ;;  %vm277_vm9 = vcmask 261120  }
  0x39   :  { %234 = vrot.lane.b32.xlu0 %v232_v41, %s962_s17  ;;  %v344_v0 = vcombine.low %v338_v60, %v342_v63  ;;  %vm203_vm10 = vcmask 130048   ;;  %vm240_vm11 = vcmask 146432   ;;  %vm314_vm12 = vcmask 269312  }
  0x3a   :  { %vm351_vm13 = vcmask 277504   ;;  %vm383_vm14 = vcmask 1039360   ;;  %vm407_vm15 = vcmask 1031168   ;;  %vm432_vm0 = vcmask 916480  }
  0x3b   :  { %vm530_vm1 = vcmask 777216   ;;  %vm505_vm2 = vcmask 785408  }
  0x3c   :  { %199 = vrot.lane.b32.xlu1 %v196_v34, %s961_s16 }
  0x3d   :  { %271 = vrot.lane.b32.xlu0 %v269_v50, %s963_s18 }
  0x40   :  { %236 = vrot.lane.b32.xlu1 %v233_v47, %s962_s17 }
  0x41   :  { %308 = vrot.lane.b32.xlu0 %v306_v57, %s964_s19 }
  0x44   :  { %273 = vrot.lane.b32.xlu1 %v270_v54, %s963_s18 }
  0x45   :  { %345 = vrot.lane.b32.xlu0 %v343_v62, %s965_s20 }
  0x48   :  { %310 = vrot.lane.b32.xlu1 %v307_v61, %s964_s19 }
  0x4c   :  { %347 = vrot.lane.b32.xlu1 %v344_v0, %s965_s20 }
  0x9a   :  { %v51_v1 = vpop.permute.xlu0 %50 }
  0x9b   :  { %v52_v2 = vrot.slane %v51_v1, 4 }
  0x9d   :  { %v54_v3 = vsel %vm53_vm3, %v52_v2, %v51_v1  ;;  %62 = vst.msk [vmem:[#allocation2 + $0x8] sm:$0xf] %vm61_vm4, %v52_v2 }
  0x9e   :  { %60 = vst.msk [vmem:[#allocation2] sm:$0xff] %vm59_vm5, %v54_v3  ;;  %v67_v5 = vpop.permute.xlu0 %66 }
  0x9f   :  { %v68_v7 = vrot.slane %v67_v5, 4 }
  0xa1   :  { %v69_v6 = vsel %vm53_vm3, %v68_v7, %v67_v5  ;;  %73 = vst.msk [vmem:[#allocation2 + $0x10] sm:$0xf] %vm61_vm4, %v68_v7  ;;  %vm456_vm3 = vcmask 908288   ;;  %vm481_vm4 = vcmask 900096  }
  0xa2   :  { %v1070_v4 = vpop.permute.xlu1 %122  ;;  %72 = vst.msk [vmem:[#allocation2 + $0x8] sm:$0xff] %vm59_vm5, %v69_v6  ;;  %vm554_vm5 = vcmask 769024  }
  0xa3   :  { %v161_v9 = vpop.permute.xlu0 %160  ;;  %v126_v20 = vrot.slane %v1070_v4, 4 }
  0xa4   :  { %v164_v10 = vrot.slane %v161_v9, 4 }
  0xa5   :  { %v1072_v11 = vld [vmem:[#allocation2] sm:$0xff] }
  0xa6   :  { %v125_v8 = vpop.permute.xlu1 %124  ;;  %v167_v12 = vsel %vm166_vm6, %v164_v10, %v161_v9  ;;  %446 = vrot.lane.b32.xlu1 %v1072_v11, %s966_s21  ;;  %v1084_v16 = vmul.f32 %v94_v46, %v1072_v11  ;;  %v444_v18 = vcombine.high %v1072_v11, %v1072_v11 }
  0xa7   :  { %v1076_v13 = vmul.f32 %v167_v12, %v1072_v11  ;;  %v1080_v15 = vpop.permute.xlu0 %197  ;;  %v127_v17 = vrot.slane %v125_v8, 4 }
  0xa8   :  { %v1098_v25 = vld [vmem:[#allocation2 + $0x10] sm:$0xf]  ;;  %v201_v32 = vrot.slane %v1080_v15, 4 }
  0xa9   :  { %v1088_v19 = vld [vmem:[#allocation2 + $0x8] sm:$0xff]  ;;  %v131_v26 = vsel %vm130_vm7, %v126_v20, %v127_v17  ;;  %v138_v30 = vmul.f32 %v127_v17, %v1098_v25 }
  0xaa   :  { %v1078_v14 = vpop.permute.xlu1 %162  ;;  %397 = vrot.lane.b32.xlu1 %v1076_v13, %s967_s22  ;;  %v445_v24 = vcombine.high %v1088_v19, %v1088_v19  ;;  %v809_v29 = vpack.i.bf16 %v1088_v19, %v444_v18  ;;  %v132_v35 = vsel %vm128_vm8, %v131_v26, %v125_v8  ;;  %v1134_v55 = vmul.f32 %v1057_v45, %v1088_v19 }
  0xab   :  { %v165_v21 = vrot.slane %v1078_v14, 4  ;;  %v1092_v23 = vpop.permute.xlu0 %234  ;;  %v137_v39 = vmul.f32 %v132_v35, %v1088_v19  ;;  %v372_v46 = vcombine.low %v138_v30, %v138_v30  ;;  %v129_v18 = vsel %vm128_vm8, %v126_v20, %v1070_v4 }
  0xac   :  { %v814_v28 = vpack.i.bf16 %v1098_v25, %v445_v24  ;;  %v238_v36 = vrot.slane %v1092_v23, 4 }
  0xad   :  { %v168_v31 = vsel %vm130_vm7, %v164_v10, %v165_v21  ;;  %v819_v61 = vpack.i.bf16 %v372_v46, %v137_v39  ;;  %v175_v8 = vmul.f32 %v165_v21, %v1098_v25  ;;  %v371_v10 = vcombine.low %v137_v39, %v137_v39 }
  0xae   :  { %v200_v22 = vpop.permute.xlu1 %199  ;;  %815 = vrot.lane.b32.xlu0 %v814_v28, %s966_s21  ;;  %810 = vrot.lane.b32.xlu1 %v809_v29, %s966_s21  ;;  %v169_v41 = vsel %vm166_vm6, %v168_v31, %v1078_v14  ;;  %v241_v12 = vsel %vm240_vm11, %v238_v36, %v1092_v23  ;;  %v136_v21 = vmul.f32 %v129_v18, %v1072_v11  ;;  %vm582_vm6 = vcmask 293888  }
  0xaf   :  { %v202_v27 = vrot.slane %v200_v22, 4  ;;  %v272_v34 = vpop.permute.xlu0 %271  ;;  %v174_v56 = vmul.f32 %v169_v41, %v1088_v19  ;;  %v247_v26 = vmul.f32 %v241_v12, %v1072_v11  ;;  %v395_v23 = vcombine.high %v1076_v13, %v1076_v13 }
  0xb0   :  { %v275_v38 = vrot.slane %v272_v34, 4  ;;  %v839_v4 = vpack.i.bf16 %v371_v10, %v136_v21  ;;  %v204_v31 = vsel %vm203_vm10, %v201_v32, %v1080_v15  ;;  %v370_v46 = vcombine.low %v136_v21, %v136_v21 }
  0xb1   :  { %v205_v40 = vsel %vm130_vm7, %v201_v32, %v202_v27  ;;  %v212_v47 = vmul.f32 %v202_v27, %v1098_v25  ;;  %v396_v2 = vcombine.high %v174_v56, %v174_v56  ;;  %v210_v39 = vmul.f32 %v204_v31, %v1072_v11 }
  0xb2   :  { %v237_v33 = vpop.permute.xlu1 %236  ;;  %v278_v44 = vsel %vm277_vm9, %v275_v38, %v272_v34  ;;  %v206_v51 = vsel %vm203_vm10, %v205_v40, %v200_v22  ;;  %v364_v10 = vcombine.high %v1134_v55, %v1134_v55 }
  0xb3   :  { %v239_v37 = vrot.slane %v237_v33, 4  ;;  %v1124_v49 = vmul.f32 %v278_v44, %v1072_v11  ;;  %v309_v54 = vpop.permute.xlu0 %308  ;;  %v211_v57 = vmul.f32 %v206_v51, %v1088_v19  ;;  %v421_v58 = vcombine.low %v212_v47, %v212_v47 }
  0xb4   :  { %v312_v62 = vrot.slane %v309_v54, 4  ;;  %v849_v14 = vpack.i.bf16 %v175_v8, %v396_v2  ;;  %v419_v51 = vcombine.low %v210_v39, %v210_v39 }
  0xb5   :  { %v242_v42 = vsel %vm130_vm7, %v238_v36, %v239_v37  ;;  %v249_v43 = vmul.f32 %v239_v37, %v1098_v25  ;;  %495 = vrot.lane.b32.xlu1 %v1124_v49, %s968_s23  ;;  %v824_v5 = vpack.i.bf16 %v421_v58, %v211_v57  ;;  %v420_v13 = vcombine.low %v211_v57, %v211_v57 }
  0xb6   :  { %v243_v48 = vsel %vm240_vm11, %v242_v42, %v237_v33  ;;  %v1126_v50 = vpop.permute.xlu1 %273  ;;  %v493_v33 = vcombine.high %v1124_v49, %v1124_v49  ;;  %v315_v35 = vsel %vm314_vm12, %v312_v62, %v309_v54  ;;  %v844_v36 = vpack.i.bf16 %v174_v56, %v395_v23 }
  0xb7   :  { %v248_v52 = vmul.f32 %v243_v48, %v1088_v19  ;;  %v470_v53 = vcombine.low %v249_v43, %v249_v43  ;;  %v276_v0 = vrot.slane %v1126_v50, 4  ;;  %v346_v27 = vpop.permute.xlu0 %345  ;;  %v321_v15 = vmul.f32 %v315_v35, %v1072_v11 }
  0xb8   :  { %v349_v30 = vrot.slane %v346_v27, 4  ;;  %v854_v41 = vpack.i.bf16 %v420_v13, %v210_v39  ;;  %v974_v56 = vmov 0  }
  0xb9   :  { %v829_v60 = vpack.i.bf16 %v470_v53, %v248_v52  ;;  %820 = vrot.lane.b32.xlu1 %v819_v61, %s970_s25  ;;  %v279_v9 = vsel %vm130_vm7, %v275_v38, %v276_v0  ;;  %v469_v22 = vcombine.low %v248_v52, %v248_v52  ;;  %v517_v54 = vcombine.low %v321_v15, %v321_v15 }
  0xba   :  { %v311_v59 = vpop.permute.xlu1 %310  ;;  %v280_v24 = vsel %vm277_vm9, %v279_v9, %v1126_v50  ;;  %v352_v40 = vsel %vm351_vm13, %v349_v30, %v346_v27  ;;  %879 = vset.pattern.permute.xlu0 %v974_v56  ;;  %v576_v50 = vld [vmem:[%s1316_s2] sm:$0xff] }
  0xbb   :  { %v313_v63 = vrot.slane %v311_v59, 4  ;;  %830 = vrot.lane.b32.xlu0 %v829_v60, %s969_s24  ;;  %v285_v20 = vmul.f32 %v280_v24, %v1088_v19  ;;  %v859_v29 = vpack.i.bf16 %v469_v22, %v247_v26  ;;  %v358_v42 = vmul.f32 %v352_v40, %v1072_v11 }
  0xbc   :  { %v286_v11 = vmul.f32 %v276_v0, %v1098_v25 }
  0xbd   :  { %v316_v45 = vsel %vm130_vm7, %v312_v62, %v313_v63  ;;  %v323_v1 = vmul.f32 %v313_v63, %v1098_v25  ;;  %825 = vrot.lane.b32.xlu1 %v824_v5, %s971_s26  ;;  %v864_v38 = vpack.i.bf16 %v285_v20, %v493_v33  ;;  %v542_v48 = vcombine.high %v358_v42, %v358_v42 }
  0xbe   :  { %v317_v3 = vsel %vm314_vm12, %v316_v45, %v311_v59  ;;  %v348_v28 = vpop.permute.xlu1 %347  ;;  %v494_v49 = vcombine.high %v285_v20, %v285_v20  ;;  %v363_v33 = vcombine.high %v1084_v16, %v1084_v16 }
  0xbf   :  { %v322_v7 = vmul.f32 %v317_v3, %v1088_v19  ;;  %v519_v6 = vcombine.low %v323_v1, %v323_v1  ;;  %v350_v34 = vrot.slane %v348_v28, 4 }
  0xc0   :  { %v869_v53 = vpack.i.bf16 %v286_v11, %v494_v49 }
  0xc1   :  { %v834_v17 = vpack.i.bf16 %v519_v6, %v322_v7  ;;  %850 = vrot.lane.b32.xlu1 %v849_v14, %s967_s22  ;;  %v518_v37 = vcombine.low %v322_v7, %v322_v7  ;;  %v353_v32 = vsel %vm130_vm7, %v349_v30, %v350_v34  ;;  %v360_v57 = vmul.f32 %v350_v34, %v1098_v25 }
  0xc2   :  { %v354_v44 = vsel %vm351_vm13, %v353_v32, %v348_v28 }
  0xc3   :  { %835 = vrot.lane.b32.xlu0 %v834_v17, %s972_s27  ;;  %v874_v43 = vpack.i.bf16 %v518_v37, %v321_v15  ;;  %v359_v47 = vmul.f32 %v354_v44, %v1088_v19  ;;  %v468_v19 = vcombine.low %v247_v26, %v247_v26 }
  0xc5   :  { %860 = vrot.lane.b32.xlu1 %v859_v29, %s969_s24  ;;  %v543_v52 = vcombine.high %v359_v47, %v359_v47 }
  0xc7   :  { %840 = vrot.lane.b32.xlu0 %v839_v4, %s970_s25 }
  0xc9   :  { %865 = vrot.lane.b32.xlu1 %v864_v38, %s968_s23 }
  0xcb   :  { %845 = vrot.lane.b32.xlu0 %v844_v36, %s967_s22 }
  0xcd   :  { %875 = vrot.lane.b32.xlu1 %v874_v43, %s972_s27 }
  0xcf   :  { %855 = vrot.lane.b32.xlu0 %v854_v41, %s971_s26 }
  0xd1   :  { %546 = vrot.lane.b32.xlu1 %v542_v48, %s973_s28 }
  0xd3   :  { %373 = vrot.lane.b32.xlu0 %v370_v46, %s970_s25 }
  0xd5   :  { %550 = vrot.lane.b32.xlu1 %v543_v52, %s973_s28 }
  0xd7   :  { %422 = vrot.lane.b32.xlu0 %v419_v51, %s971_s26 }
  0xd9   :  { %544 = vrot.lane.b32.xlu1 %v358_v42, %s973_s28 }
  0xdb   :  { %870 = vrot.lane.b32.xlu0 %v869_v53, %s968_s23 }
  0xdf   :  { %471 = vrot.lane.b32.xlu0 %v468_v19, %s969_s24 }
  0xe3   :  { %520 = vrot.lane.b32.xlu0 %v517_v54, %s972_s27 }
  0xe7   :  { %548 = vrot.lane.b32.xlu0 %v359_v47, %s973_s28 }
  0xeb   :  { %552 = vrot.lane.b32.xlu0 %v360_v57, %s973_s28 }
  0xef   :  { %579 = vperm.xlu0 %879, %v576_v50  }
 0x118   :  { %v1199_v58 = vpop.permute.xlu1 %446 }
 0x11c   :  { %v1201_v59 = vpop.permute.xlu1 %397 }
 0x120   :  { %v1203_v60 = vpop.permute.xlu1 %810  ;;  %v1207_v62 = vpop.permute.xlu0 %815 }
 0x121   :  { %v813_v52 = vunpack.i.h.bf16 %v1203_v60  ;;  %v812_v11 = vunpack.i.l.bf16 %v1203_v60  ;;  %v818_v54 = vunpack.i.h.bf16 %v1207_v62 }
 0x127   :  { %v1205_v61 = vpop.permute.xlu1 %495 }
 0x12b   :  { %v821_v63 = vpop.permute.xlu1 %820 }
 0x12c   :  { %v823_v45 = vunpack.i.h.bf16 %v821_v63  ;;  %v822_v1 = vunpack.i.l.bf16 %v821_v63 }
 0x12d   :  { %v1209_v0 = vpop.permute.xlu0 %830 }
 0x12e   :  { %v387_v9 = vsel %vm383_vm14, %v822_v1, %v823_v45  ;;  %v833_v56 = vunpack.i.h.bf16 %v1209_v0  ;;  %v832_v63 = vunpack.i.l.bf16 %v1209_v0 }
 0x12f   :  { %v826_v25 = vpop.permute.xlu1 %825  ;;  %v562_v14 = vsel %vm130_vm7, %v364_v10, %v387_v9 }
 0x130   :  { %v828_v2 = vunpack.i.h.bf16 %v826_v25  ;;  %v827_v3 = vunpack.i.l.bf16 %v826_v25 }
 0x132   :  { %v436_v18 = vsel %vm432_vm0, %v827_v3, %v828_v2  ;;  %v817_v2 = vunpack.i.l.bf16 %v1207_v62 }
 0x133   :  { %v851_v7 = vpop.permute.xlu1 %850 }
 0x134   :  { %v853_v6 = vunpack.i.h.bf16 %v851_v7  ;;  %v852_v8 = vunpack.i.l.bf16 %v851_v7 }
 0x135   :  { %v1211_v5 = vpop.permute.xlu0 %835 }
 0x136   :  { %v411_v17 = vsel %vm407_vm15, %v852_v8, %v853_v6  ;;  %v837_v0 = vunpack.i.l.bf16 %v1211_v5 }
 0x137   :  { %v1218_v22 = vpop.permute.xlu1 %860  ;;  %v566_v21 = vsel %vm130_vm7, %v411_v17, %v436_v18  ;;  %v485_v17 = vsel %vm481_vm4, %v832_v63, %v833_v56 }
 0x138   :  { %v777_v24 = vpack.c.bf16 %v566_v21, %v562_v14  ;;  %v863_v34 = vunpack.i.h.bf16 %v1218_v22  ;;  %v862_v13 = vunpack.i.l.bf16 %v1218_v22 }
 0x139   :  { %v841_v12 = vpop.permute.xlu0 %840 }
 0x13a   :  { %v843_v26 = vunpack.i.h.bf16 %v841_v12  ;;  %v842_v27 = vunpack.i.l.bf16 %v841_v12  ;;  %778 = vmatprep.subr.bf16.mxu1 %v777_v24  ;;  %v483_v57 = vsel %vm481_vm4, %v862_v13, %v863_v34  ;;  %v484_v62 = vsel %vm481_vm4, %v863_v34, %v832_v63 }
 0x13b   :  { %v1222_v28 = vpop.permute.xlu1 %865  ;;  %v459_v24 = vsel %vm456_vm3, %v813_v52, %v817_v2 }
 0x13c   :  { %v385_v29 = vsel %vm383_vm14, %v842_v27, %v843_v26  ;;  %v386_v30 = vsel %vm383_vm14, %v843_v26, %v822_v1  ;;  %v868_v44 = vunpack.i.h.bf16 %v1222_v28  ;;  %v867_v46 = vunpack.i.l.bf16 %v1222_v28 }
 0x13d   :  { %v846_v23 = vpop.permute.xlu0 %845  ;;  %v560_v40 = vsel %vm130_vm7, %v363_v33, %v385_v29  ;;  %v561_v15 = vsel %vm130_vm7, %v1134_v55, %v386_v30  ;;  %v569_v29 = vsel %vm130_vm7, %v459_v24, %v484_v62 }
 0x13e   :  { %v848_v4 = vunpack.i.h.bf16 %v846_v23  ;;  %v847_v20 = vunpack.i.l.bf16 %v846_v23  ;;  %v507_v50 = vsel %vm505_vm2, %v867_v46, %v868_v44 }
 0x13f   :  { %v1230_v37 = vpop.permute.xlu1 %875 }
 0x140   :  { %v878_v38 = vunpack.i.h.bf16 %v1230_v37  ;;  %v877_v39 = vunpack.i.l.bf16 %v1230_v37  ;;  %v409_v32 = vsel %vm407_vm15, %v847_v20, %v848_v4  ;;  %v410_v42 = vsel %vm407_vm15, %v848_v4, %v852_v8 }
 0x141   :  { %v856_v31 = vpop.permute.xlu0 %855  ;;  %v408_v45 = vsel %vm407_vm15, %v1201_v59, %v847_v20  ;;  %v838_v8 = vunpack.i.h.bf16 %v1211_v5 }
 0x142   :  { %v858_v35 = vunpack.i.h.bf16 %v856_v31  ;;  %v857_v36 = vunpack.i.l.bf16 %v856_v31  ;;  %v532_v53 = vsel %vm530_vm1, %v877_v39, %v878_v38  ;;  %v533_v26 = vsel %vm530_vm1, %v878_v38, %v837_v0 }
 0x143   :  { %v572_v1 = vsel %vm130_vm7, %v507_v50, %v532_v53  ;;  %v547_v18 = vpop.permute.xlu1 %546  ;;  %v534_v5 = vsel %vm530_vm1, %v837_v0, %v838_v8  ;;  %v457_v38 = vsel %vm456_vm3, %v1199_v58, %v812_v11  ;;  %v575_v58 = vld [vmem:[%s1315_s1] sm:$0xff]  ;;  %s975_s1 = smov [#allocation8]  }
 0x144   :  { %v434_v41 = vsel %vm432_vm0, %v857_v36, %v858_v35  ;;  %v435_v43 = vsel %vm432_vm0, %v858_v35, %v827_v3  ;;  %v458_v3 = vsel %vm456_vm3, %v812_v11, %v813_v52  ;;  %s750_s6 = sshll.u32 %s975_s1, 4  ;;  %s751_s6 = int_to_ptr.vmem [resolvable:$true] %s750_s6 }
 0x145   :  { %v374_v47 = vpop.permute.xlu0 %373  ;;  %v564_v48 = vsel %vm130_vm7, %v409_v32, %v434_v41  ;;  %v565_v49 = vsel %vm130_vm7, %v410_v42, %v435_v43  ;;  %v568_v10 = vsel %vm130_vm7, %v458_v3, %v483_v57  ;;  %s925_s7 = scalar_lea.vmem %s751_s6, 512  ;;  %p930_p3 = scmp.lt.s32.totalorder %s751_s6, %s751_s6 }
 0x146   :  { %v769_v55 = vpack.c.bf16 %v564_v48, %v560_v40  ;;  %v779_v51 = vpack.c.bf16 %v565_v49, %v561_v15  ;;  %v384_v19 = vsel %vm383_vm14, %v374_v47, %v842_v27  ;;  %v773_v59 = vpack.c.bf16 %v572_v1, %v568_v10  ;;  %p926_p2 = scmp.ne.s32.totalorder %s751_s6, %s925_s7  ;;  %p931_p4 = scmp.lt.s32.totalorder %s925_s7, %s925_s7 }
 0x147   :  { %v559_v7 = vsel %vm130_vm7, %v1084_v16, %v384_v19  ;;  %v460_v16 = vsel %vm456_vm3, %v817_v2, %v818_v54  ;;  %v551_v34 = vpop.permute.xlu1 %550  ;;  %v506_v40 = vsel %vm505_vm2, %v1205_v61, %v867_v46 }
 0x148   :  { %770 = vmatprep.subr.bf16.mxu0 %v769_v55  ;;  %780 = vmatpush1.bf16.msra.mxu1 %v779_v51  ;;  %v570_v4 = vsel %vm130_vm7, %v460_v16, %v485_v17  ;;  %p932_p5 = por %p931_p4, %p930_p3 }
 0x149   :  { %v423_v60 = vpop.permute.xlu0 %422 }
 0x14a   :  { %v433_v25 = vsel %vm432_vm0, %v423_v60, %v857_v36  ;;  %p933_p6 = pnand %p932_p5, %p926_p2 }
 0x14b   :  { %v563_v6 = vsel %vm130_vm7, %v408_v45, %v433_v25  ;;  %v545_v42 = vpop.permute.xlu1 %544 }
 0x14c   :  { %v771_v9 = vpack.c.bf16 %v563_v6, %v559_v7  ;;  %v555_v61 = vsel %vm554_vm5, %v545_v42, %v547_v18 }
 0x14d   :  { %v871_v12 = vpop.permute.xlu0 %870 }
 0x14e   :  { %v873_v14 = vunpack.i.h.bf16 %v871_v12  ;;  %v872_v21 = vunpack.i.l.bf16 %v871_v12  ;;  %772 = vmatpush1.bf16.msra.mxu0 %v771_v9 }
 0x14f   :  { %774 = vmatprep.subr.bf16.mxu0 %v773_v59 }
 0x150   :  { %v508_v27 = vsel %vm505_vm2, %v868_v44, %v872_v21  ;;  %v509_v23 = vsel %vm505_vm2, %v872_v21, %v873_v14 }
 0x151   :  { %v472_v28 = vpop.permute.xlu0 %471  ;;  %v574_v20 = vsel %vm130_vm7, %v509_v23, %v534_v5  ;;  %v573_v30 = vsel %vm130_vm7, %v508_v27, %v533_v26 }
 0x152   :  { %v781_v31 = vpack.c.bf16 %v574_v20, %v570_v4  ;;  %v783_v33 = vpack.c.bf16 %v573_v30, %v569_v29  ;;  %v482_v35 = vsel %vm481_vm4, %v472_v28, %v862_v13 }
 0x153   :  { %v567_v32 = vsel %vm130_vm7, %v457_v38, %v482_v35 }
 0x154   :  { %782 = vmatprep.subr.bf16.mxu1 %v781_v31 }
 0x155   :  { %v521_v36 = vpop.permute.xlu0 %520  ;;  %784 = vmatpush1.bf16.msra.mxu1 %v783_v33 }
 0x156   :  { %v531_v15 = vsel %vm530_vm1, %v521_v36, %v877_v39 }
 0x157   :  { %v571_v41 = vsel %vm130_vm7, %v506_v40, %v531_v15 }
 0x158   :  { %v775_v22 = vpack.c.bf16 %v571_v41, %v567_v32 }
 0x159   :  { %v549_v13 = vpop.permute.xlu0 %548 }
 0x15a   :  { %v556_v43 = vsel %vm554_vm5, %v547_v18, %v549_v13  ;;  %776 = vmatpush1.bf16.msra.mxu0 %v775_v22  ;;  %v557_v44 = vsel %vm554_vm5, %v549_v13, %v551_v34 }
 0x15b   :  { %763 = vmatprep.subr.msk.mxu0 %vm130_vm7, %v556_v43 }
 0x15d   :  { %v553_v37 = vpop.permute.xlu0 %552 }
 0x15e   :  { %v558_v39 = vsel %vm554_vm5, %v551_v34, %v553_v37  ;;  %764 = vmatpush1.msk.msra.mxu0 %vm130_vm7, %v555_v61 }
 0x15f   :  { %766 = vmatprep.subr.msk.mxu1 %vm130_vm7, %v558_v39  ;;  %765 = vmatmul.mubr.msk.f32.vlgmr.msra.gmra.mrb[0].mxu0 %vm582_vm6, %v575_v58 }
 0x160   :  { %767 = vmatpush1.msk.msra.mxu1 %vm130_vm7, %v557_v44 }
 0x161   :  { %768 = vmatmul.mubr.msk.f32.vlgmr.msra.gmra.mrb[0].mxu1 %vm582_vm6, %v575_v58 }
 0x16e   :  { %v580_v46 = vpop.permute.xlu0 %579 }
 0x232   :  { %v660_v47 = vpop.f32.mrb[0].mxu0 }
 0x233   :  { %v661_v48 = vadd.f32 %v660_v47, %v580_v46  ;;  %v662_v49 = vpop.f32.mrb[1].mxu0 }
 0x234   :  { %v663_v55 = vadd.f32 %v662_v49, %v580_v46  ;;  %v731_v51 = vpop.f32.mrb[0].mxu1 }
 0x235   :  { %v736_v52 = vmax.f32 %v661_v48, 0.0  ;;  %v732_v11 = vadd.f32 %v731_v51, %v580_v46  ;;  %v733_v53 = vpop.f32.mrb[1].mxu1 }
 0x236   :  { %v737_v19 = vmax.f32 %v663_v55, 0.0  ;;  %v734_v54 = vadd.f32 %v733_v53, %v580_v46 }
 0x237   :  { %740 = vst [vmem:[#allocation8] sm:$0xff] %v736_v52  ;;  %v738_v56 = vmax.f32 %v732_v11, 0.0 }
 0x238   :  { %741 = vst [vmem:[#allocation8 + $0x8] sm:$0xff] %v737_v19  ;;  %v739_v57 = vmax.f32 %v734_v54, 0.0 }
 0x239   :  { %743 = vst [vmem:[#allocation8 + $0x10] sm:$0xff] %v738_v56 }
 0x23a   :  { %744 = vst [vmem:[#allocation8 + $0x18] sm:$0xff] %v739_v57 }
 0x23b   :  { %936 = shalt.err (!%p933_p6)
}
 0x23c   :  { %s937_s10 = scalar_lea.hbm %s1318_s4, 512 }
 0x23d   :  { %p938_p7 = scmp.ne.s32.totalorder %s1318_s4, %s937_s10  ;;  %p941_p8 = scmp.lt.u32.totalorder %s937_s10, %s1318_s4 }
 0x23f   :  { %p943_p9 = pnand %p941_p8, %p938_p7 }
 0x241   :  { %946 = shalt.err (!%p943_p9)
}
 0x242   :  { %s976_s3 = smov 256  }
 0x243   :  { %756 = dma.vmem_to_hbm [thread:$0]  %s751_s6, 512, %s1318_s4, [#allocation5], %s976_s3, %s976_s3, %s961_s16  }
 0x244   :  { %951 = dma.done.wait [#allocation5], 512  }
 0x245   :  { %952 = vsyncadd [#allocation5], 4294966784 }
 0x246   :  { %760 = vsyncpa [#allocation4], 1 }
 0x247   :  { %761 = vsyncpa [#allocation7], 1 }
 0x248   :  { %762 = vsyncpa [#allocation5], 1 }

</bundles_post_ra>
